<compile_context>
chip_gen: v6e
topology: v6e:2x2x1
jax: 0.10.0
libtpu: 0.0.40
codegen_flags: <defaults>
</compile_context>

<pallas_src>
import functools

import jax
import jax.numpy as jnp
from jax.experimental import pallas as pl
from jax.experimental.pallas import tpu as pltpu


def _round_up(x, m):
    return ((x + m - 1) // m) * m


def _sublane_multiple(dtype):
    # Native sublane tile: 8 for 4-byte, 16 for 2-byte, 32 for 1-byte dtypes.
    itemsize = jnp.dtype(dtype).itemsize
    return max(8, 32 // max(1, itemsize))


def _vmem_capacity_bytes():
    try:
        return int(pltpu.get_tpu_info().vmem_capacity_bytes)
    except Exception:
        return 64 * 1024 * 1024  # conservative (v7x per-TensorCore)


def _fusion_kernel(feat_dims, k_offsets, k_blocks, *refs):
    # refs = (f_0 .. f_{n-1}, stacked_wt, bias, out, slab_scratch)
    n = len(feat_dims)
    feat_refs = refs[:n]
    w_ref = refs[n]
    b_ref = refs[n + 1]
    o_ref = refs[n + 2]
    slab_ref = refs[n + 3]

    # Pack feature tiles into one lane-aligned K slab (VMEM-only copies).
    # Padding lanes are zeroed every step (megacore-safe: no reliance on a
    # program_id==0 init of persistent scratch), so garbage never reaches the
    # MXU even though the matching weight rows are zero anyway.
    for f_ref, d, off, blk in zip(feat_refs, feat_dims, k_offsets, k_blocks):
        slab_ref[:, off:off + d] = f_ref[...].astype(slab_ref.dtype)
        if d < blk:
            slab_ref[:, off + d:off + blk] = jnp.zeros(
                (slab_ref.shape[0], blk - d), slab_ref.dtype)

    # Single K = sum(round_up(d_i,128)) matmul; exactly cat(features) @ W^T.
    acc = jnp.dot(slab_ref[...], w_ref[...], preferred_element_type=jnp.float32)
    o_ref[...] = (acc + b_ref[...]).astype(o_ref.dtype)


def prepare_fusion_params(weight, bias, feat_dims, param_dtype=None):
    """One-time parameter preprocessing (hoisted out of the per-call path).

    weight: (latent_dim, input_dim) like nn.Linear.weight
    bias:   (latent_dim,)
    feat_dims: per-feature trailing dims summing to input_dim.

    Builds ONE stacked W^T of shape (K_pad, latent_pad): each feature's
    column block W_i^T is placed at a 128-aligned row offset with zero rows
    in between, so the kernel can run a single fused dot.
    """
    latent_dim, input_dim = weight.shape
    feat_dims = tuple(int(d) for d in feat_dims)
    assert sum(feat_dims) == input_dim
    if param_dtype is None:
        param_dtype = weight.dtype

    latent_mult = 256 if latent_dim > 128 else 128   # 2x256 MXU on v6e/v7x
    latent_pad = _round_up(latent_dim, latent_mult)

    k_blocks = tuple(_round_up(d, 128) for d in feat_dims)
    k_offsets = []
    off = 0
    for blk in k_blocks:
        k_offsets.append(off)
        off += blk
    k_pad = off

    wt = jnp.zeros((k_pad, latent_pad), dtype=param_dtype)
    col = 0
    for d, k_off in zip(feat_dims, k_offsets):
        block = jnp.transpose(weight[:, col:col + d]).astype(param_dtype)  # (d, L)
        wt = wt.at[k_off:k_off + d, :latent_dim].set(block)
        col += d

    bias2d = jnp.zeros((1, latent_pad), dtype=jnp.float32)
    bias2d = bias2d.at[0, :latent_dim].set(bias.astype(jnp.float32))

    return {
        "wt": wt,
        "bias": bias2d,
        "feat_dims": feat_dims,
        "k_offsets": tuple(k_offsets),
        "k_blocks": k_blocks,
        "latent_dim": int(latent_dim),
    }


def fusion_layer_apply(params, *features, tile_m=1024, tile_n=512):
    """Forward pass: equivalent to nn.Linear(torch.cat(features, dim=-1))."""
    feat_dims = params["feat_dims"]
    assert len(features) == len(feat_dims)
    for f, d in zip(features, feat_dims):
        assert f.shape[-1] == d

    wt = params["wt"]
    bias2d = params["bias"]
    k_offsets = params["k_offsets"]
    k_blocks = params["k_blocks"]
    latent_dim = params["latent_dim"]
    k_pad, latent_pad = wt.shape

    lead_shape = features[0].shape[:-1]
    batch = 1
    for s in lead_shape:
        batch *= int(s)

    compute_dtype = jnp.result_type(*[f.dtype for f in features])
    out_dtype = compute_dtype

    # Batch tile: large (HBM / per-step-overhead bound), rounded to the
    # dtype-native sublane multiple so loads/stores stay unmasked.
    sub = _sublane_multiple(compute_dtype)
    tm = min(int(tile_m), _round_up(batch, sub))
    tm = max(sub, _round_up(tm, sub))

    # Latent (N) tile: lane-dense (multiple of 128), <= tile_n, divides
    # latent_pad.  Bounds per-step weight residency (v7x 64 MiB VMEM) and
    # gives the second v7x TensorCore work even when the batch grid is short.
    tn = latent_pad
    for cand in (int(tile_n), 512, 256, 128):
        if cand % 128 == 0 and cand <= latent_pad and latent_pad % cand == 0:
            tn = cand
            break

    # No wrapper-side padding/concat of activations: just flatten leading dims.
    feats_2d = [f.reshape(batch, f.shape[-1]) for f in features]

    grid = (pl.cdiv(batch, tm), latent_pad // tn)

    in_specs = (
        [pl.BlockSpec((tm, d), lambda i, j: (i, 0)) for d in feat_dims]
        # Constant batch-index blocks: not re-DMA'd per batch tile.
        # (If Mosaic double-buffers them, pipeline_mode=pl.Buffered(1) would
        #  halve their footprint; the VMEM estimate below assumes 2 buffers.)
        + [pl.BlockSpec((k_pad, tn), lambda i, j: (0, j)),
           pl.BlockSpec((1, tn), lambda i, j: (0, j))]
    )
    out_specs = pl.BlockSpec((tm, tn), lambda i, j: (i, j))

    # VMEM budget from actual dtypes & buffer counts (+ slab scratch).
    need = 0
    for f, d in zip(features, feat_dims):
        need += 2 * tm * d * jnp.dtype(f.dtype).itemsize          # double-buffered
    need += 2 * k_pad * tn * jnp.dtype(wt.dtype).itemsize          # weights
    need += 2 * tn * jnp.dtype(bias2d.dtype).itemsize              # bias
    need += 2 * tm * tn * jnp.dtype(out_dtype).itemsize            # output
    need += tm * k_pad * jnp.dtype(compute_dtype).itemsize         # slab scratch
    cap = _vmem_capacity_bytes()
    vmem_limit = int(min(max(32 * 1024 * 1024, 2 * need + (4 << 20)),
                         int(0.75 * cap)))

    kernel = functools.partial(_fusion_kernel, feat_dims, k_offsets, k_blocks)

    out = pl.pallas_call(
        kernel,
        out_shape=jax.ShapeDtypeStruct((batch, latent_pad), out_dtype),
        grid_spec=pltpu.PrefetchScalarGridSpec(
            num_scalar_prefetch=0,
            grid=grid,
            in_specs=in_specs,
            out_specs=out_specs,
            scratch_shapes=[pltpu.VMEM((tm, k_pad), compute_dtype)],
        ),
        compiler_params=pltpu.CompilerParams(
            dimension_semantics=("parallel", "parallel"),
            vmem_limit_bytes=vmem_limit,
        ),
    )(*feats_2d, wt, bias2d)

    out = out[:, :latent_dim]
    return out.reshape(*lead_shape, latent_dim)


def fusion_layer(weight, bias, *features):
    """Convenience wrapper (prep + apply); cache prepare_fusion_params in prod."""
    feat_dims = [f.shape[-1] for f in features]
    params = prepare_fusion_params(weight, bias, feat_dims)
    return fusion_layer_apply(params, *features)


if __name__ == "__main__":
    key = jax.random.PRNGKey(0)
    k1, k2, k3, kw, kb = jax.random.split(key, 5)

    # Small shapes: 3 feature streams of dims 16, 24, 8 -> input_dim = 48
    batch = 16
    d1, d2, d3 = 16, 24, 8
    input_dim = d1 + d2 + d3
    latent_dim = 32

    f1 = jax.random.normal(k1, (batch, d1), dtype=jnp.float32)
    f2 = jax.random.normal(k2, (batch, d2), dtype=jnp.float32)
    f3 = jax.random.normal(k3, (batch, d3), dtype=jnp.float32)

    # Deterministic parameter init (uniform like nn.Linear's default range).
    bound = 1.0 / jnp.sqrt(input_dim)
    weight = jax.random.uniform(kw, (latent_dim, input_dim),
                                minval=-bound, maxval=bound, dtype=jnp.float32)
    bias = jax.random.uniform(kb, (latent_dim,),
                              minval=-bound, maxval=bound, dtype=jnp.float32)

    # One-time parameter preprocessing, then the fused forward pass.
    params = prepare_fusion_params(weight, bias, (d1, d2, d3))
    out = fusion_layer_apply(params, f1, f2, f3)
    jax.block_until_ready(out)

    # Cross-check against the plain-JAX reference of the PyTorch semantics.
    ref = jnp.concatenate([f1, f2, f3], axis=-1) @ weight.T + bias
    assert out.shape == (batch, latent_dim)
    assert jnp.allclose(out, ref, atol=1e-5, rtol=1e-5), float(
        jnp.max(jnp.abs(out - ref)))

    print("KERNEL_OK")
</pallas_src>

<mosaic_0001>
module attributes {stable_mosaic.version = 11 : i64} {
  func.func @_fusion_kernel(%arg0: i32, %arg1: i32, %arg2: memref<16x16xf32, #tpu.memory_space<vmem>>, %arg3: memref<16x24xf32, #tpu.memory_space<vmem>>, %arg4: memref<16x8xf32, #tpu.memory_space<vmem>>, %arg5: memref<384x128xf32, #tpu.memory_space<vmem>>, %arg6: memref<1x128xf32, #tpu.memory_space<vmem>>, %arg7: memref<16x128xf32, #tpu.memory_space<vmem>>, %arg8: memref<16x384xf32, #tpu.memory_space<vmem>>) attributes {dimension_semantics = [#tpu.dimension_semantics<parallel>, #tpu.dimension_semantics<parallel>], iteration_bounds = array<i64: 1, 1>, scalar_prefetch = 0 : i64, scratch_operands = 1 : i64, tpu.core_type = #tpu.core_type<tc>, window_params = [{transform_indices = @transform_0, window_bounds = array<i64: 16, 16>}, {transform_indices = @transform_1, window_bounds = array<i64: 16, 24>}, {transform_indices = @transform_2, window_bounds = array<i64: 16, 8>}, {transform_indices = @transform_3, window_bounds = array<i64: 384, 128>}, {transform_indices = @transform_4, window_bounds = array<i64: 1, 128>}, {transform_indices = @transform_5, window_bounds = array<i64: 16, 128>}]} {
    %c0 = arith.constant 0 : index
    %c0_0 = arith.constant 0 : index
    %0 = vector.load %arg2[%c0, %c0_0] : memref<16x16xf32, #tpu.memory_space<vmem>>, vector<16x16xf32>
    %c0_1 = arith.constant 0 : index
    %c0_2 = arith.constant 0 : index
    %1 = vector.load %arg8[%c0_1, %c0_2] : memref<16x384xf32, #tpu.memory_space<vmem>>, vector<16x16xf32>
    tpu.vector_store %arg8[%c0_1, %c0_2], %0 {strides = array<i32>} : memref<16x384xf32, #tpu.memory_space<vmem>>, vector<16x16xf32>,
    %cst = arith.constant 0.000000e+00 : f32
    %2 = vector.broadcast %cst : f32 to vector<16x112xf32>
    %c0_3 = arith.constant 0 : index
    %c16 = arith.constant 16 : index
    %3 = vector.load %arg8[%c0_3, %c16] : memref<16x384xf32, #tpu.memory_space<vmem>>, vector<16x112xf32>
    tpu.vector_store %arg8[%c0_3, %c16], %2 {strides = array<i32>} : memref<16x384xf32, #tpu.memory_space<vmem>>, vector<16x112xf32>,
    %c0_4 = arith.constant 0 : index
    %c0_5 = arith.constant 0 : index
    %4 = vector.load %arg3[%c0_4, %c0_5] : memref<16x24xf32, #tpu.memory_space<vmem>>, vector<16x24xf32>
    %c0_6 = arith.constant 0 : index
    %c128 = arith.constant 128 : index
    %5 = vector.load %arg8[%c0_6, %c128] : memref<16x384xf32, #tpu.memory_space<vmem>>, vector<16x24xf32>
    tpu.vector_store %arg8[%c0_6, %c128], %4 {strides = array<i32>} : memref<16x384xf32, #tpu.memory_space<vmem>>, vector<16x24xf32>,
    %cst_7 = arith.constant 0.000000e+00 : f32
    %6 = vector.broadcast %cst_7 : f32 to vector<16x104xf32>
    %c0_8 = arith.constant 0 : index
    %c152 = arith.constant 152 : index
    %7 = vector.load %arg8[%c0_8, %c152] : memref<16x384xf32, #tpu.memory_space<vmem>>, vector<16x104xf32>
    tpu.vector_store %arg8[%c0_8, %c152], %6 {strides = array<i32>} : memref<16x384xf32, #tpu.memory_space<vmem>>, vector<16x104xf32>,
    %c0_9 = arith.constant 0 : index
    %c0_10 = arith.constant 0 : index
    %8 = vector.load %arg4[%c0_9, %c0_10] : memref<16x8xf32, #tpu.memory_space<vmem>>, vector<16x8xf32>
    %c0_11 = arith.constant 0 : index
    %c256 = arith.constant 256 : index
    %9 = vector.load %arg8[%c0_11, %c256] : memref<16x384xf32, #tpu.memory_space<vmem>>, vector<16x8xf32>
    tpu.vector_store %arg8[%c0_11, %c256], %8 {strides = array<i32>} : memref<16x384xf32, #tpu.memory_space<vmem>>, vector<16x8xf32>,
    %cst_12 = arith.constant 0.000000e+00 : f32
    %10 = vector.broadcast %cst_12 : f32 to vector<16x120xf32>
    %c0_13 = arith.constant 0 : index
    %c264 = arith.constant 264 : index
    %11 = vector.load %arg8[%c0_13, %c264] : memref<16x384xf32, #tpu.memory_space<vmem>>, vector<16x120xf32>
    tpu.vector_store %arg8[%c0_13, %c264], %10 {strides = array<i32>} : memref<16x384xf32, #tpu.memory_space<vmem>>, vector<16x120xf32>,
    %c0_14 = arith.constant 0 : index
    %c0_15 = arith.constant 0 : index
    %12 = vector.load %arg8[%c0_14, %c0_15] : memref<16x384xf32, #tpu.memory_space<vmem>>, vector<16x384xf32>
    %c0_16 = arith.constant 0 : index
    %c0_17 = arith.constant 0 : index
    %13 = vector.load %arg5[%c0_16, %c0_17] : memref<384x128xf32, #tpu.memory_space<vmem>>, vector<384x128xf32>
    %cst_18 = arith.constant dense<0.000000e+00> : vector<16x128xf32>
    %14 = tpu.matmul %12, %13, %cst_18 {dimension_numbers = #tpu.dot_dimension_numbers<[1], [0], [0], [1], [0, 0, 1, 1], [], []>} : vector<16x384xf32>, vector<384x128xf32>, vector<16x128xf32> -> vector<16x128xf32>
    %c0_19 = arith.constant 0 : index
    %c0_20 = arith.constant 0 : index
    %15 = vector.load %arg6[%c0_19, %c0_20] : memref<1x128xf32, #tpu.memory_space<vmem>>, vector<1x128xf32>
    %16 = vector.broadcast %15 : vector<1x128xf32> to vector<16x128xf32>
    %17 = arith.addf %14, %16 : vector<16x128xf32>
    %c0_21 = arith.constant 0 : index
    %c0_22 = arith.constant 0 : index
    %18 = vector.load %arg7[%c0_21, %c0_22] : memref<16x128xf32, #tpu.memory_space<vmem>>, vector<16x128xf32>
    tpu.vector_store %arg7[%c0_21, %c0_22], %17 {strides = array<i32>} : memref<16x128xf32, #tpu.memory_space<vmem>>, vector<16x128xf32>,
    return
  }
  func.func @transform_0(%arg0: i32, %arg1: i32) -> (i32, i32) {
    %c0_i32 = arith.constant 0 : i32
    %c0_i32_0 = arith.constant 0 : i32
    return %arg0, %c0_i32 : i32, i32
  }
  func.func @transform_1(%arg0: i32, %arg1: i32) -> (i32, i32) {
    %c0_i32 = arith.constant 0 : i32
    %c0_i32_0 = arith.constant 0 : i32
    return %arg0, %c0_i32 : i32, i32
  }
  func.func @transform_2(%arg0: i32, %arg1: i32) -> (i32, i32) {
    %c0_i32 = arith.constant 0 : i32
    %c0_i32_0 = arith.constant 0 : i32
    return %arg0, %c0_i32 : i32, i32
  }
  func.func @transform_3(%arg0: i32, %arg1: i32) -> (i32, i32) {
    %c0_i32 = arith.constant 0 : i32
    %c0_i32_0 = arith.constant 0 : i32
    return %c0_i32, %arg1 : i32, i32
  }
  func.func @transform_4(%arg0: i32, %arg1: i32) -> (i32, i32) {
    %c0_i32 = arith.constant 0 : i32
    %c0_i32_0 = arith.constant 0 : i32
    return %c0_i32, %arg1 : i32, i32
  }
  func.func @transform_5(%arg0: i32, %arg1: i32) -> (i32, i32) {
    %c0_i32 = arith.constant 0 : i32
    return %arg0, %arg1 : i32, i32
  }
}

</mosaic_0001>

<bundles_post_ra>
// kernel: tpu_custom_call.1
= control target key start
LH: loop header
LB: loop body
LE: loop exit
PB: predicated region body
PF: predicated region fallthrough
CT: control target
= control target key end

     0   :  { %10 = vsyncpa [#allocation4], 0  ;;  %s549_s0 = inlined_call_operand.vmem [shape: f32[16,16], index: 0, kind: input, shape index: {}]   ;;  %s550_s1 = inlined_call_operand.hbm [shape: f32[16,24], index: 1, kind: input, shape index: {}]   ;;  %s551_s2 = inlined_call_operand.vmem [shape: f32[16,8], index: 2, kind: input, shape index: {}]   ;;  %s552_s3 = inlined_call_operand.hbm [shape: f32[384,128], index: 3, kind: input, shape index: {}]   ;;  %s553_s4 = inlined_call_operand.vmem [shape: f32[1,128], index: 4, kind: input, shape index: {}]   ;;  %s554_s5 = inlined_call_operand.hbm [shape: f32[16,128], index: 5, kind: output, shape index: {}]  }
   0x1   :  { %11 = vsyncpa [#allocation7], 0 }
   0x2   :  { %12 = vsyncpa [#allocation5], 0  ;;  %s468_s18 = smov [#allocation3]  }
   0x3   :  { %s20_s19 = sshll.u32 %s468_s18, 4  ;;  %s21_s19 = int_to_ptr.vmem [resolvable:$true] %s20_s19 }
   0x4   :  { %s410_s20 = scalar_lea.vmem %s21_s19, 256  ;;  %p415_p1 = scmp.lt.s32.totalorder %s21_s19, %s21_s19 }
   0x5   :  { %p411_p0 = scmp.ne.s32.totalorder %s21_s19, %s410_s20  ;;  %p416_p2 = scmp.lt.s32.totalorder %s410_s20, %s410_s20 }
   0x7   :  { %p417_p3 = por %p416_p2, %p415_p1 }
   0x9   :  { %p418_p4 = pnand %p417_p3, %p411_p0 }
   0xb   :  { %421 = shalt.err (!%p418_p4)
}
   0xc   :  { %s469_s21 = smov 128   ;;  %s470_s22 = smov 8  }
   0xd   :  { %26 = dma.hbm_to_vmem [thread:$0]  %s550_s1, 256, %s21_s19, [#allocation4], %s469_s21, %s469_s21, %s470_s22  }
   0xe   :  { %s471_s25 = smov [#allocation6]  }
   0xf   :  { %s34_s26 = sshll.u32 %s471_s25, 4  ;;  %s35_s26 = int_to_ptr.vmem [resolvable:$true] %s34_s26 }
  0x10   :  { %s430_s27 = scalar_lea.vmem %s35_s26, 6144  ;;  %p435_p6 = scmp.lt.s32.totalorder %s35_s26, %s35_s26 }
  0x11   :  { %p431_p5 = scmp.ne.s32.totalorder %s35_s26, %s430_s27  ;;  %p436_p7 = scmp.lt.s32.totalorder %s430_s27, %s430_s27 }
  0x13   :  { %p437_p8 = por %p436_p7, %p435_p6 }
  0x15   :  { %p438_p9 = pnand %p437_p8, %p431_p5 }
  0x17   :  { %441 = shalt.err (!%p438_p9)
}
  0x18   :  { %40 = dma.hbm_to_vmem [thread:$0]  %s552_s3, 6144, %s35_s26, [#allocation7], %s469_s21, %s469_s21, %s470_s22  }
  0x19   :  { %462 = dma.done.wait [#allocation4], 256  }
  0x1a   :  { %463 = vsyncadd [#allocation4], 4294967040 }
  0x1b   :  { %464 = dma.done.wait [#allocation7], 6144  }
  0x1c   :  { %465 = vsyncadd [#allocation7], 4294961152  ;;  %v110_v0 = vld [vmem:[#allocation6 + $0xf8] sm:$0xff]  ;;  %v109_v2 = vld [vmem:[#allocation6 + $0xf0] sm:$0xff]  ;;  %vm59_vm0 = vcmask 195584   ;;  %vm51_vm1 = vcmask 130048  }
  0x1d   :  { %v94_v1 = vld [vmem:[#allocation6 + $0x78] sm:$0xff]  ;;  %305 = vmatprep.subr.mxu0 %v110_v0  ;;  %v93_v3 = vld [vmem:[#allocation6 + $0x70] sm:$0xff]  ;;  %v108_v5 = vld [vmem:[#allocation6 + $0xe8] sm:$0xff]  ;;  %vm62_vm2 = vcmask 1047744   ;;  %vm54_vm3 = vcmask 1047680   ;;  %vm67_vm4 = vcmask 64512  }
  0x1e   :  { %v126_v4 = vld [vmem:[#allocation6 + $0x178] sm:$0xff]  ;;  %306 = vmatpush3.msra.mxu0 %v94_v1  ;;  %v125_v6 = vld [vmem:[#allocation6 + $0x170] sm:$0xff]  ;;  %v92_v7 = vld [vmem:[#allocation6 + $0x68] sm:$0xff]  ;;  %vm70_vm5 = vcmask 1047616   ;;  %v472_v33 = vmov 0.0   ;;  %s473_s11 = smov [#allocation8]  }
  0x1f   :  { %361 = vmatprep.subr.mxu1 %v126_v4  ;;  %307 = vmatprep.subr.mxu0 %v109_v2  ;;  %v124_v8 = vld [vmem:[#allocation6 + $0x168] sm:$0xff]  ;;  %v107_v9 = vld [vmem:[#allocation6 + $0xe0] sm:$0xff]  ;;  %v106_v12 = vld [vmem:[#allocation6 + $0xd8] sm:$0xff]  ;;  %s291_s12 = sshll.u32 %s473_s11, 4  ;;  %s292_s12 = int_to_ptr.vmem [resolvable:$true] %s291_s12 }
  0x20   :  { %362 = vmatpush3.msra.mxu1 %v126_v4  ;;  %308 = vmatpush3.msra.mxu0 %v93_v3  ;;  %v91_v10 = vld [vmem:[#allocation6 + $0x60] sm:$0xff]  ;;  %v90_v13 = vld [vmem:[#allocation6 + $0x58] sm:$0xff]  ;;  %v105_v15 = vld [vmem:[#allocation6 + $0xd0] sm:$0xff]  ;;  %s442_s13 = scalar_lea.vmem %s292_s12, 256  ;;  %p447_p11 = scmp.lt.s32.totalorder %s292_s12, %s292_s12 }
  0x21   :  { %363 = vmatprep.subr.mxu1 %v125_v6  ;;  %309 = vmatprep.subr.mxu0 %v108_v5  ;;  %v123_v11 = vld [vmem:[#allocation6 + $0x160] sm:$0xff]  ;;  %v122_v14 = vld [vmem:[#allocation6 + $0x158] sm:$0xff]  ;;  %v89_v16 = vld [vmem:[#allocation6 + $0x50] sm:$0xff]  ;;  %p443_p10 = scmp.ne.s32.totalorder %s292_s12, %s442_s13  ;;  %p448_p12 = scmp.lt.s32.totalorder %s442_s13, %s442_s13 }
  0x22   :  { %364 = vmatpush3.msra.mxu1 %v125_v6  ;;  %310 = vmatpush3.msra.mxu0 %v92_v7  ;;  %v121_v17 = vld [vmem:[#allocation6 + $0x150] sm:$0xff]  ;;  %v104_v18 = vld [vmem:[#allocation6 + $0xc8] sm:$0xff]  ;;  %v103_v21 = vld [vmem:[#allocation6 + $0xc0] sm:$0xff] }
  0x23   :  { %365 = vmatprep.subr.mxu1 %v124_v8  ;;  %311 = vmatprep.subr.mxu0 %v107_v9  ;;  %v88_v19 = vld [vmem:[#allocation6 + $0x48] sm:$0xff]  ;;  %v87_v22 = vld [vmem:[#allocation6 + $0x40] sm:$0xff]  ;;  %v102_v24 = vld [vmem:[#allocation6 + $0xb8] sm:$0xff]  ;;  %p449_p13 = por %p448_p12, %p447_p11 }
  0x24   :  { %366 = vmatpush3.msra.mxu1 %v124_v8  ;;  %312 = vmatpush3.msra.mxu0 %v91_v10  ;;  %v120_v20 = vld [vmem:[#allocation6 + $0x148] sm:$0xff]  ;;  %v119_v23 = vld [vmem:[#allocation6 + $0x140] sm:$0xff]  ;;  %v86_v25 = vld [vmem:[#allocation6 + $0x38] sm:$0xff] }
  0x25   :  { %367 = vmatprep.subr.mxu1 %v123_v11  ;;  %313 = vmatprep.subr.mxu0 %v106_v12  ;;  %v101_v26 = vld [vmem:[#allocation6 + $0xb0] sm:$0xff]  ;;  %v118_v27 = vld [vmem:[#allocation6 + $0x138] sm:$0xff]  ;;  %v49_v29 = vld [vmem:[%s549_s0] sm:$0xff]  ;;  %p450_p0 = pnand %p449_p13, %p443_p10 }
  0x26   :  { %368 = vmatpush3.msra.mxu1 %v123_v11  ;;  %314 = vmatpush3.msra.mxu0 %v90_v13  ;;  %v57_v28 = vld [vmem:[#allocation3] sm:$0xff]  ;;  %52 = vst.msk [vmem:[#allocation2] sm:$0xff] %vm51_vm1, %v49_v29  ;;  %v58_v32 = vld [vmem:[#allocation3 + $0x8] sm:$0xff]  ;;  %v65_v34 = vld [vmem:[%s551_s2] sm:$0xff] }
  0x27   :  { %369 = vmatprep.subr.mxu1 %v122_v14  ;;  %315 = vmatprep.subr.mxu0 %v105_v15  ;;  %v85_v30 = vld [vmem:[#allocation6 + $0x30] sm:$0xff]  ;;  %60 = vst.msk [vmem:[#allocation2 + $0x8] sm:$0xff] %vm59_vm0, %v57_v28  ;;  %61 = vst.msk [vmem:[#allocation2 + $0x20] sm:$0xff] %vm59_vm0, %v58_v32  ;;  %v50_v35 = vld [vmem:[%s549_s0 + $0x8] sm:$0xff] }
  0x28   :  { %370 = vmatpush3.msra.mxu1 %v122_v14  ;;  %316 = vmatpush3.msra.mxu0 %v89_v16  ;;  %v117_v31 = vld [vmem:[#allocation6 + $0x130] sm:$0xff]  ;;  %63 = vst.msk [vmem:[#allocation2 + $0x8] sm:$0xff] %vm62_vm2, %v472_v33  ;;  %v66_v36 = vld [vmem:[%s551_s2 + $0x8] sm:$0xff]  ;;  %64 = vst.msk [vmem:[#allocation2 + $0x20] sm:$0xff] %vm62_vm2, %v472_v33 }
  0x29   :  { %371 = vmatprep.subr.mxu1 %v121_v17  ;;  %317 = vmatprep.subr.mxu0 %v104_v18  ;;  %55 = vst.msk [vmem:[#allocation2] sm:$0xff] %vm54_vm3, %v472_v33  ;;  %v100_v37 = vld [vmem:[#allocation6 + $0xa8] sm:$0xff]  ;;  %v99_v40 = vld [vmem:[#allocation6 + $0xa0] sm:$0xff]  ;;  %v98_v43 = vld [vmem:[#allocation6 + $0x98] sm:$0xff] }
  0x2a   :  { %372 = vmatpush3.msra.mxu1 %v121_v17  ;;  %318 = vmatpush3.msra.mxu0 %v88_v19  ;;  %68 = vst.msk [vmem:[#allocation2 + $0x10] sm:$0xff] %vm67_vm4, %v65_v34  ;;  %69 = vst.msk [vmem:[#allocation2 + $0x28] sm:$0xff] %vm67_vm4, %v66_v36  ;;  %v84_v38 = vld [vmem:[#allocation6 + $0x28] sm:$0xff]  ;;  %v83_v41 = vld [vmem:[#allocation6 + $0x20] sm:$0xff] }
  0x2b   :  { %373 = vmatprep.subr.mxu1 %v120_v20  ;;  %319 = vmatprep.subr.mxu0 %v103_v21  ;;  %53 = vst.msk [vmem:[#allocation2 + $0x18] sm:$0xff] %vm51_vm1, %v50_v35  ;;  %v116_v39 = vld [vmem:[#allocation6 + $0x128] sm:$0xff]  ;;  %v115_v42 = vld [vmem:[#allocation6 + $0x120] sm:$0xff]  ;;  %v82_v44 = vld [vmem:[#allocation6 + $0x18] sm:$0xff] }
  0x2c   :  { %374 = vmatpush3.msra.mxu1 %v120_v20  ;;  %320 = vmatpush3.msra.mxu0 %v87_v22  ;;  %71 = vst.msk [vmem:[#allocation2 + $0x10] sm:$0xff] %vm70_vm5, %v472_v33  ;;  %72 = vst.msk [vmem:[#allocation2 + $0x28] sm:$0xff] %vm70_vm5, %v472_v33  ;;  %v114_v45 = vld [vmem:[#allocation6 + $0x118] sm:$0xff]  ;;  %v97_v46 = vld [vmem:[#allocation6 + $0x90] sm:$0xff] }
  0x2d   :  { %375 = vmatprep.subr.mxu1 %v119_v23  ;;  %321 = vmatprep.subr.mxu0 %v102_v24  ;;  %56 = vst.msk [vmem:[#allocation2 + $0x18] sm:$0xff] %vm54_vm3, %v472_v33  ;;  %v81_v47 = vld [vmem:[#allocation6 + $0x10] sm:$0xff]  ;;  %v96_v49 = vld [vmem:[#allocation6 + $0x88] sm:$0xff]  ;;  %v95_v52 = vld [vmem:[#allocation6 + $0x80] sm:$0xff] }
  0x2e   :  { %376 = vmatpush3.msra.mxu1 %v119_v23  ;;  %322 = vmatpush3.msra.mxu0 %v86_v25  ;;  %v113_v48 = vld [vmem:[#allocation6 + $0x110] sm:$0xff]  ;;  %v80_v51 = vld [vmem:[#allocation6 + $0x8] sm:$0xff]  ;;  %v79_v54 = vld [vmem:[#allocation6] sm:$0xff] }
  0x2f   :  { %377 = vmatprep.subr.mxu1 %v118_v27  ;;  %323 = vmatprep.subr.mxu0 %v101_v26  ;;  %v74_v50 = vld [vmem:[#allocation2 + $0x8] sm:$0xff]  ;;  %v111_v56 = vld [vmem:[#allocation6 + $0x100] sm:$0xff] }
  0x30   :  { %378 = vmatpush3.msra.mxu1 %v118_v27  ;;  %324 = vmatpush3.msra.mxu0 %v85_v30  ;;  %v112_v53 = vld [vmem:[#allocation6 + $0x108] sm:$0xff]  ;;  %v73_v55 = vld [vmem:[#allocation2] sm:$0xff] }
  0x31   :  { %379 = vmatprep.subr.mxu1 %v117_v31  ;;  %325 = vmatprep.subr.mxu0 %v100_v37  ;;  %v77_v57 = vld [vmem:[#allocation2 + $0x20] sm:$0xff] }
  0x32   :  { %380 = vmatpush3.msra.mxu1 %v117_v31  ;;  %326 = vmatpush3.msra.mxu0 %v84_v38  ;;  %v304_v63 = vld [vmem:[%s553_s4] ss:$0 sm:$0xff] }
  0x33   :  { %381 = vmatprep.subr.mxu1 %v116_v39  ;;  %327 = vmatprep.subr.mxu0 %v99_v40  ;;  %v75_v58 = vld [vmem:[#allocation2 + $0x10] sm:$0xff]  ;;  %v78_v59 = vld [vmem:[#allocation2 + $0x28] sm:$0xff] }
  0x34   :  { %382 = vmatpush3.msra.mxu1 %v116_v39  ;;  %328 = vmatpush3.msra.mxu0 %v83_v41  ;;  %v76_v60 = vld [vmem:[#allocation2 + $0x18] sm:$0xff] }
  0x35   :  { %383 = vmatprep.subr.mxu1 %v115_v42  ;;  %329 = vmatprep.subr.mxu0 %v98_v43 }
  0x36   :  { %384 = vmatpush3.msra.mxu1 %v115_v42  ;;  %330 = vmatpush3.msra.mxu0 %v82_v44 }
  0x37   :  { %385 = vmatprep.subr.mxu1 %v114_v45  ;;  %331 = vmatprep.subr.mxu0 %v97_v46 }
  0x38   :  { %386 = vmatpush3.msra.mxu1 %v114_v45  ;;  %332 = vmatpush3.msra.mxu0 %v81_v47 }
  0x39   :  { %387 = vmatprep.subr.mxu1 %v113_v48  ;;  %333 = vmatprep.subr.mxu0 %v96_v49 }
  0x3a   :  { %198 = vmatprep.mubr.f32.mxu0 %v74_v50  ;;  %334 = vmatpush3.msra.mxu0 %v80_v51 }
  0x3b   :  { %388 = vmatpush3.msra.mxu1 %v113_v48  ;;  %335 = vmatprep.subr.mxu0 %v95_v52 }
  0x3c   :  { %389 = vmatprep.subr.mxu1 %v112_v53  ;;  %336 = vmatpush3.msra.mxu0 %v79_v54 }
  0x3d   :  { %390 = vmatpush3.msra.mxu1 %v112_v53  ;;  %199 = vmatmul.mubr.f32.vlgmr.msra.gmra.mxu0 %v73_v55 }
  0x3e   :  { %391 = vmatprep.subr.mxu1 %v111_v56  ;;  %203 = vmatprep.mubr.f32.mxu0 %v77_v57 }
  0x3f   :  { %392 = vmatpush3.msra.mxu1 %v111_v56  ;;  %393 = vmatprep.mubr.f32.mxu1 %v75_v58 }
  0x40   :  { %394 = vmatmul.mubr.f32.vlgmr.msra.gmra.mxu1 %v78_v59 }
  0x41   :  { %204 = vmatmul.mubr.f32.gmra.mxu0 %v76_v60 }
  0xfd   :  { %v337_v61 = vpop.f32.mrf.mxu0 }
  0xff   :  { %v338_v62 = vpop.f32.mrf.mxu0 }
 0x100   :  { %v339_v0 = vadd.f32 %v338_v62, %v337_v61  ;;  %v395_v1 = vpop.f32.mrf.mxu1 }
 0x101   :  { %v340_v2 = vpop.f32.mrf.mxu0 }
 0x102   :  { %v201_v3 = vadd.f32 %v339_v0, %v304_v63  ;;  %v275_v4 = vpop.f32.mrf.mxu1 }
 0x103   :  { %v341_v5 = vpop.f32.mrf.mxu0 }
 0x104   :  { %v342_v6 = vadd.f32 %v341_v5, %v340_v2  ;;  %v276_v7 = vadd.f32 %v275_v4, %v201_v3 }
 0x106   :  { %v206_v8 = vadd.f32 %v342_v6, %v304_v63  ;;  %284 = vst [vmem:[#allocation8] sm:$0xff] %v276_v7 }
 0x108   :  { %v281_v9 = vadd.f32 %v395_v1, %v206_v8 }
 0x10a   :  { %285 = vst [vmem:[#allocation8 + $0x8] sm:$0xff] %v281_v9 }
 0x10b   :  { %453 = shalt.err (!%p450_p0)
}
 0x10c   :  { %297 = dma.vmem_to_hbm [thread:$0]  %s292_s12, 256, %s554_s5, [#allocation5], %s469_s21, %s469_s21, %s470_s22  }
 0x10d   :  { %466 = dma.done.wait [#allocation5], 256  }
 0x10e   :  { %467 = vsyncadd [#allocation5], 4294967040 }
 0x10f   :  { %301 = vsyncpa [#allocation4], 1 }
 0x110   :  { %302 = vsyncpa [#allocation7], 1 }
 0x111   :  { %303 = vsyncpa [#allocation5], 1 }

</bundles_post_ra>
